<compile_context>
chip_gen: v6e
topology: v6e:2x2x1
jax: 0.10.0
libtpu: 0.0.40
codegen_flags: <defaults>
</compile_context>

<pallas_src>
import jax
import jax.numpy as jnp
from jax.experimental import pallas as pl
from jax.experimental.pallas import tpu as pltpu

# Logical model dims (from the PyTorch module)
IN_F = 2
HID_F = 4
OUT_F = 1

LANE = 128                 # TPU lane width; batch tiles are multiples of this
DEFAULT_BLOCK_B = 4096     # batch rows per grid step (multiple of 128)


def _mlp_kernel(x_ref, w1_ref, b1_ref, w2_ref, b2_ref, o_ref):
    """Pure-VPU MLP tile.

    x_ref : (IN_F, tb) f32 VMEM, feature-major (batch on the 128-lane axis)
    w1_ref: (HID_F*IN_F,) f32 SMEM, row-major PyTorch layout W1[j, k] -> [j*IN_F+k]
    b1_ref: (HID_F,)  f32 SMEM
    w2_ref: (HID_F,)  f32 SMEM (row 0 of PyTorch W2)
    b2_ref: (OUT_F,)  f32 SMEM
    o_ref : (1, tb)   f32 VMEM, lane-dense output row
    """
    x0 = x_ref[0:1, :]            # (1, tb)
    x1 = x_ref[1:2, :]            # (1, tb)

    acc = None
    for j in range(HID_F):        # static unroll: 4 hidden units
        h = x0 * w1_ref[2 * j] + x1 * w1_ref[2 * j + 1] + b1_ref[j]
        h = jnp.maximum(h, 0.0)   # ReLU on the VPU
        c = h * w2_ref[j]
        acc = c if acc is None else acc + c

    o_ref[...] = acc + b2_ref[0]  # (1, tb) lane-dense store


def prepare_params(w1, b1, w2, b2):
    """Flatten PyTorch-layout params once (model init, not per call).

    w1: (4, 2), b1: (4,), w2: (1, 4), b2: (1,) -- PyTorch (out, in) layout.
    """
    return (w1.reshape(-1).astype(jnp.float32),   # (HID_F*IN_F,)
            b1.astype(jnp.float32),               # (HID_F,)
            w2.reshape(-1).astype(jnp.float32),   # (HID_F,)
            b2.astype(jnp.float32))               # (OUT_F,)


def simple_nn_forward(x, params, *, block_b=DEFAULT_BLOCK_B):
    """x: (B, 2) float32. params: output of prepare_params. Returns (B, 1)."""
    w1_flat, b1, w2_flat, b2 = params
    B = x.shape[0]

    b_lanes = ((B + LANE - 1) // LANE) * LANE       # batch rounded to lane width
    tb = min(block_b, b_lanes)
    tb = ((tb + LANE - 1) // LANE) * LANE           # batch tile, multiple of 128
    bp = ((B + tb - 1) // tb) * tb                  # padded batch, multiple of tb

    # Single fused transpose+pad -> feature-major, lane-dense activation slab.
    x_fm = jnp.zeros((IN_F, bp), jnp.float32).at[:, :B].set(
        x.astype(jnp.float32).T)

    out = pl.pallas_call(
        _mlp_kernel,
        out_shape=jax.ShapeDtypeStruct((1, bp), jnp.float32),
        grid_spec=pltpu.PrefetchScalarGridSpec(
            num_scalar_prefetch=0,
            grid=(bp // tb,),
            in_specs=[
                pl.BlockSpec((IN_F, tb), lambda i: (0, i)),            # x tile
                pl.BlockSpec(memory_space=pltpu.MemorySpace.SMEM),     # W1
                pl.BlockSpec(memory_space=pltpu.MemorySpace.SMEM),     # b1
                pl.BlockSpec(memory_space=pltpu.MemorySpace.SMEM),     # W2
                pl.BlockSpec(memory_space=pltpu.MemorySpace.SMEM),     # b2
            ],
            out_specs=pl.BlockSpec((1, tb), lambda i: (0, i)),
        ),
        compiler_params=pltpu.CompilerParams(
            dimension_semantics=("parallel",)),      # shard batch tiles across TCs
    )(x_fm, w1_flat, b1, w2_flat, b2)

    return out[0, :B].reshape(B, OUT_F)


def _reference(x, w1, b1, w2, b2):
    h = jnp.maximum(x @ w1.T + b1, 0.0)
    return h @ w2.T + b2


if __name__ == "__main__":
    key = jax.random.PRNGKey(0)
    k_x, k_w1, k_b1, k_w2, k_b2, k_x2 = jax.random.split(key, 6)

    # Deterministic parameter init (uniform, same bounds as PyTorch Linear default).
    bound1 = 1.0 / (IN_F ** 0.5)
    bound2 = 1.0 / (HID_F ** 0.5)
    w1 = jax.random.uniform(k_w1, (HID_F, IN_F), jnp.float32, -bound1, bound1)
    b1 = jax.random.uniform(k_b1, (HID_F,), jnp.float32, -bound1, bound1)
    w2 = jax.random.uniform(k_w2, (OUT_F, HID_F), jnp.float32, -bound2, bound2)
    b2 = jax.random.uniform(k_b2, (OUT_F,), jnp.float32, -bound2, bound2)

    params = prepare_params(w1, b1, w2, b2)

    # Small batch (single grid step).
    batch = 8
    x = jax.random.normal(k_x, (batch, IN_F), jnp.float32)
    out = jax.block_until_ready(simple_nn_forward(x, params))
    ref = _reference(x, w1, b1, w2, b2)
    assert out.shape == (batch, OUT_F), out.shape
    assert jnp.allclose(out, ref, atol=1e-5, rtol=1e-5), (out, ref)

    # Ragged batch with a multi-step grid (exercises padding + tiling path).
    batch2 = 300
    x2 = jax.random.normal(k_x2, (batch2, IN_F), jnp.float32)
    out2 = jax.block_until_ready(simple_nn_forward(x2, params, block_b=128))
    ref2 = _reference(x2, w1, b1, w2, b2)
    assert out2.shape == (batch2, OUT_F), out2.shape
    assert jnp.allclose(out2, ref2, atol=1e-5, rtol=1e-5), (out2, ref2)

    print("KERNEL_OK")
</pallas_src>

<mosaic_0001>
module attributes {stable_mosaic.version = 11 : i64} {
  func.func @_mlp_kernel(%arg0: i32, %arg1: memref<2x128xf32, #tpu.memory_space<vmem>>, %arg2: memref<8xf32, #tpu.memory_space<smem>>, %arg3: memref<4xf32, #tpu.memory_space<smem>>, %arg4: memref<4xf32, #tpu.memory_space<smem>>, %arg5: memref<1xf32, #tpu.memory_space<smem>>, %arg6: memref<1x128xf32, #tpu.memory_space<vmem>>) attributes {dimension_semantics = [#tpu.dimension_semantics<parallel>], iteration_bounds = array<i64: 1>, scalar_prefetch = 0 : i64, scratch_operands = 0 : i64, tpu.core_type = #tpu.core_type<tc>, window_params = [{transform_indices = @transform_0, window_bounds = array<i64: 2, 128>}, {transform_indices = @transform_1, window_bounds = array<i64: 8>}, {transform_indices = @transform_2, window_bounds = array<i64: 4>}, {transform_indices = @transform_3, window_bounds = array<i64: 4>}, {transform_indices = @transform_4, window_bounds = array<i64: 1>}, {transform_indices = @transform_5, window_bounds = array<i64: 1, 128>}]} {
    %c0 = arith.constant 0 : index
    %c0_0 = arith.constant 0 : index
    %0 = vector.load %arg1[%c0, %c0_0] : memref<2x128xf32, #tpu.memory_space<vmem>>, vector<1x128xf32>
    %c1 = arith.constant 1 : index
    %c0_1 = arith.constant 0 : index
    %1 = vector.load %arg1[%c1, %c0_1] : memref<2x128xf32, #tpu.memory_space<vmem>>, vector<1x128xf32>
    %c0_2 = arith.constant 0 : index
    %2 = memref.load %arg2[%c0_2] : memref<8xf32, #tpu.memory_space<smem>>
    %3 = vector.broadcast %2 : f32 to vector<1x128xf32>
    %4 = arith.mulf %0, %3 : vector<1x128xf32>
    %c1_3 = arith.constant 1 : index
    %5 = memref.load %arg2[%c1_3] : memref<8xf32, #tpu.memory_space<smem>>
    %6 = vector.broadcast %5 : f32 to vector<1x128xf32>
    %7 = arith.mulf %1, %6 : vector<1x128xf32>
    %8 = arith.addf %4, %7 : vector<1x128xf32>
    %c0_4 = arith.constant 0 : index
    %9 = memref.load %arg3[%c0_4] : memref<4xf32, #tpu.memory_space<smem>>
    %10 = vector.broadcast %9 : f32 to vector<1x128xf32>
    %11 = arith.addf %8, %10 : vector<1x128xf32>
    %cst = arith.constant 0.000000e+00 : f32
    %12 = vector.broadcast %cst : f32 to vector<1x128xf32>
    %13 = arith.maximumf %11, %12 : vector<1x128xf32>
    %c0_5 = arith.constant 0 : index
    %14 = memref.load %arg4[%c0_5] : memref<4xf32, #tpu.memory_space<smem>>
    %15 = vector.broadcast %14 : f32 to vector<1x128xf32>
    %16 = arith.mulf %13, %15 : vector<1x128xf32>
    %c2 = arith.constant 2 : index
    %17 = memref.load %arg2[%c2] : memref<8xf32, #tpu.memory_space<smem>>
    %18 = vector.broadcast %17 : f32 to vector<1x128xf32>
    %19 = arith.mulf %0, %18 : vector<1x128xf32>
    %c3 = arith.constant 3 : index
    %20 = memref.load %arg2[%c3] : memref<8xf32, #tpu.memory_space<smem>>
    %21 = vector.broadcast %20 : f32 to vector<1x128xf32>
    %22 = arith.mulf %1, %21 : vector<1x128xf32>
    %23 = arith.addf %19, %22 : vector<1x128xf32>
    %c1_6 = arith.constant 1 : index
    %24 = memref.load %arg3[%c1_6] : memref<4xf32, #tpu.memory_space<smem>>
    %25 = vector.broadcast %24 : f32 to vector<1x128xf32>
    %26 = arith.addf %23, %25 : vector<1x128xf32>
    %cst_7 = arith.constant 0.000000e+00 : f32
    %27 = vector.broadcast %cst_7 : f32 to vector<1x128xf32>
    %28 = arith.maximumf %26, %27 : vector<1x128xf32>
    %c1_8 = arith.constant 1 : index
    %29 = memref.load %arg4[%c1_8] : memref<4xf32, #tpu.memory_space<smem>>
    %30 = vector.broadcast %29 : f32 to vector<1x128xf32>
    %31 = arith.mulf %28, %30 : vector<1x128xf32>
    %32 = arith.addf %16, %31 : vector<1x128xf32>
    %c4 = arith.constant 4 : index
    %33 = memref.load %arg2[%c4] : memref<8xf32, #tpu.memory_space<smem>>
    %34 = vector.broadcast %33 : f32 to vector<1x128xf32>
    %35 = arith.mulf %0, %34 : vector<1x128xf32>
    %c5 = arith.constant 5 : index
    %36 = memref.load %arg2[%c5] : memref<8xf32, #tpu.memory_space<smem>>
    %37 = vector.broadcast %36 : f32 to vector<1x128xf32>
    %38 = arith.mulf %1, %37 : vector<1x128xf32>
    %39 = arith.addf %35, %38 : vector<1x128xf32>
    %c2_9 = arith.constant 2 : index
    %40 = memref.load %arg3[%c2_9] : memref<4xf32, #tpu.memory_space<smem>>
    %41 = vector.broadcast %40 : f32 to vector<1x128xf32>
    %42 = arith.addf %39, %41 : vector<1x128xf32>
    %cst_10 = arith.constant 0.000000e+00 : f32
    %43 = vector.broadcast %cst_10 : f32 to vector<1x128xf32>
    %44 = arith.maximumf %42, %43 : vector<1x128xf32>
    %c2_11 = arith.constant 2 : index
    %45 = memref.load %arg4[%c2_11] : memref<4xf32, #tpu.memory_space<smem>>
    %46 = vector.broadcast %45 : f32 to vector<1x128xf32>
    %47 = arith.mulf %44, %46 : vector<1x128xf32>
    %48 = arith.addf %32, %47 : vector<1x128xf32>
    %c6 = arith.constant 6 : index
    %49 = memref.load %arg2[%c6] : memref<8xf32, #tpu.memory_space<smem>>
    %50 = vector.broadcast %49 : f32 to vector<1x128xf32>
    %51 = arith.mulf %0, %50 : vector<1x128xf32>
    %c7 = arith.constant 7 : index
    %52 = memref.load %arg2[%c7] : memref<8xf32, #tpu.memory_space<smem>>
    %53 = vector.broadcast %52 : f32 to vector<1x128xf32>
    %54 = arith.mulf %1, %53 : vector<1x128xf32>
    %55 = arith.addf %51, %54 : vector<1x128xf32>
    %c3_12 = arith.constant 3 : index
    %56 = memref.load %arg3[%c3_12] : memref<4xf32, #tpu.memory_space<smem>>
    %57 = vector.broadcast %56 : f32 to vector<1x128xf32>
    %58 = arith.addf %55, %57 : vector<1x128xf32>
    %cst_13 = arith.constant 0.000000e+00 : f32
    %59 = vector.broadcast %cst_13 : f32 to vector<1x128xf32>
    %60 = arith.maximumf %58, %59 : vector<1x128xf32>
    %c3_14 = arith.constant 3 : index
    %61 = memref.load %arg4[%c3_14] : memref<4xf32, #tpu.memory_space<smem>>
    %62 = vector.broadcast %61 : f32 to vector<1x128xf32>
    %63 = arith.mulf %60, %62 : vector<1x128xf32>
    %64 = arith.addf %48, %63 : vector<1x128xf32>
    %c0_15 = arith.constant 0 : index
    %65 = memref.load %arg5[%c0_15] : memref<1xf32, #tpu.memory_space<smem>>
    %66 = vector.broadcast %65 : f32 to vector<1x128xf32>
    %67 = arith.addf %64, %66 : vector<1x128xf32>
    %c0_16 = arith.constant 0 : index
    %c0_17 = arith.constant 0 : index
    %68 = vector.load %arg6[%c0_16, %c0_17] : memref<1x128xf32, #tpu.memory_space<vmem>>, vector<1x128xf32>
    tpu.vector_store %arg6[%c0_16, %c0_17], %67 {strides = array<i32>} : memref<1x128xf32, #tpu.memory_space<vmem>>, vector<1x128xf32>,
    return
  }
  func.func @transform_0(%arg0: i32) -> (i32, i32) {
    %c0_i32 = arith.constant 0 : i32
    %c0_i32_0 = arith.constant 0 : i32
    return %c0_i32, %arg0 : i32, i32
  }
  func.func @transform_1(%arg0: i32) -> i32 {
    %c0_i32 = arith.constant 0 : i32
    %c0_i32_0 = arith.constant 0 : i32
    return %c0_i32 : i32
  }
  func.func @transform_2(%arg0: i32) -> i32 {
    %c0_i32 = arith.constant 0 : i32
    %c0_i32_0 = arith.constant 0 : i32
    return %c0_i32 : i32
  }
  func.func @transform_3(%arg0: i32) -> i32 {
    %c0_i32 = arith.constant 0 : i32
    %c0_i32_0 = arith.constant 0 : i32
    return %c0_i32 : i32
  }
  func.func @transform_4(%arg0: i32) -> i32 {
    %c0_i32 = arith.constant 0 : i32
    %c0_i32_0 = arith.constant 0 : i32
    return %c0_i32 : i32
  }
  func.func @transform_5(%arg0: i32) -> (i32, i32) {
    %c0_i32 = arith.constant 0 : i32
    %c0_i32_0 = arith.constant 0 : i32
    return %c0_i32, %arg0 : i32, i32
  }
}

</mosaic_0001>

<bundles_post_ra>
// kernel: tpu_custom_call.1
= control target key start
LH: loop header
LB: loop body
LE: loop exit
PB: predicated region body
PF: predicated region fallthrough
CT: control target
= control target key end

     0   :  { %11 = vsyncpa [#allocation5], 0  ;;  %s282_s0 = inlined_call_operand.vmem [shape: f32[2,128], index: 0, kind: input, shape index: {}]   ;;  %s283_s1 = inlined_call_operand.vmem [shape: f32[8], index: 1, kind: input, shape index: {}]   ;;  %s284_s2 = inlined_call_operand.vmem [shape: f32[4], index: 2, kind: input, shape index: {}]   ;;  %s285_s3 = inlined_call_operand.vmem [shape: f32[4], index: 3, kind: input, shape index: {}]   ;;  %s286_s4 = inlined_call_operand.<no memory space> [shape: f32[1], index: 4, kind: input, shape index: {}]   ;;  %s287_s5 = inlined_call_operand.hbm [shape: f32[1,128], index: 5, kind: output, shape index: {}]  }
   0x1   :  { %12 = vsyncpa [#allocation7], 0  ;;  %s32_s20 = sshll.u32 %s284_s2, 4  ;;  %s33_s20 = int_to_ptr.vmem [resolvable:$true] %s32_s20 }
   0x2   :  { %13 = vsyncpa [#allocation4], 0  ;;  %s22_s23 = sshll.u32 %s283_s1, 4  ;;  %s156_s24 = scalar_lea.vmem %s33_s20, 16  ;;  %s23_s23 = int_to_ptr.vmem [resolvable:$true] %s22_s23 }
   0x3   :  { %p157_p0 = scmp.ne.s32.totalorder %s33_s20, %s156_s24  ;;  %p161_p1 = scmp.lt.s32.totalorder %s33_s20, %s33_s20 }
   0x4   :  { %p162_p2 = scmp.lt.s32.totalorder %s156_s24, %s156_s24 }
   0x6   :  { %p163_p3 = por %p162_p2, %p161_p1 }
   0x8   :  { %p164_p4 = pnand %p163_p3, %p157_p0 }
   0xa   :  { %167 = shalt.err (!%p164_p4)
}
   0xb   :  { %s218_s25 = smov [#allocation6]   ;;  %s168_s26 = scalar_lea.vmem %s23_s23, 16 }
   0xc   :  { %35 = dma.vmem_to_smem %s33_s20, 16, %s218_s25, [#allocation7]  }
   0xd   :  { %p169_p5 = scmp.ne.s32.totalorder %s23_s23, %s168_s26  ;;  %p173_p6 = scmp.lt.s32.totalorder %s23_s23, %s23_s23 }
   0xe   :  { %p174_p7 = scmp.lt.s32.totalorder %s168_s26, %s168_s26 }
  0x10   :  { %p175_p8 = por %p174_p7, %p173_p6 }
  0x12   :  { %p176_p9 = pnand %p175_p8, %p169_p5 }
  0x14   :  { %179 = shalt.err (!%p176_p9)
}
  0x15   :  { %s219_s2 = smov [#allocation3]   ;;  %s42_s28 = sshll.u32 %s285_s3, 4  ;;  %s43_s28 = int_to_ptr.vmem [resolvable:$true] %s42_s28 }
  0x16   :  { %25 = dma.vmem_to_smem %s23_s23, 16, %s219_s2, [#allocation5]  }
  0x17   :  { %s180_s29 = scalar_lea.vmem %s43_s28, 16  ;;  %p185_p11 = scmp.lt.s32.totalorder %s43_s28, %s43_s28 }
  0x18   :  { %p181_p10 = scmp.ne.s32.totalorder %s43_s28, %s180_s29  ;;  %p186_p12 = scmp.lt.s32.totalorder %s180_s29, %s180_s29 }
  0x1a   :  { %p187_p13 = por %p186_p12, %p185_p11 }
  0x1c   :  { %p188_p0 = pnand %p187_p13, %p181_p10 }
  0x1e   :  { %191 = shalt.err (!%p188_p0)
}
  0x1f   :  { %s220_s30 = smov [#allocation8]  }
  0x20   :  { %45 = dma.vmem_to_smem %s43_s28, 16, %s220_s30, [#allocation7]  }
  0x21   :  { %212 = dma.done.wait [#allocation5], 16  }
  0x22   :  { %213 = vsyncadd [#allocation5], 4294967280 }
  0x23   :  { %214 = dma.done.wait [#allocation7], 32  }
  0x24   :  { %215 = vsyncadd [#allocation7], 4294967264 }
  0x25   :  { %57 = sfence }
  0x26   :  { %s60_s6 = sld [smem:[#allocation3]]  ;;  %v58_v0 = vld [vmem:[%s282_s0] sm:$0x1]  ;;  %v59_v1 = vld [vmem:[%s282_s0 + $0x1] sm:$0x1]  ;;  %v120_v44 = vstv %s286_s4  ;;  %s221_s26 = smov [#allocation9]  }
  0x27   :  { %s139_s7 = sld [smem:[#allocation3 + $0x1]]  ;;  %s129_s2 = sshll.u32 %s221_s26, 4  ;;  %s130_s2 = int_to_ptr.vmem [resolvable:$true] %s129_s2 }
  0x28   :  { %s67_s8 = sld [smem:[#allocation6]]  ;;  %s192_s1 = scalar_lea.vmem %s130_s2, 16 }
  0x29   :  { %s261_s9 = sld [smem:[#allocation8]]  ;;  %p193_p1 = scmp.ne.s32.totalorder %s130_s2, %s192_s1 }
  0x2a   :  { %s140_s11 = sld [smem:[#allocation3 + $0x2]]  ;;  %s196_s27 = scalar_lea.vmem %s130_s2, 32 }
  0x2b   :  { %s141_s14 = sld [smem:[#allocation3 + $0x3]]  ;;  %p197_p2 = scmp.lt.s32.totalorder %s130_s2, %s130_s2 }
  0x2c   :  { %v61_v2 = vstv %s60_s6  ;;  %s142_s15 = sld [smem:[#allocation6 + $0x1]]  ;;  %p198_p3 = scmp.lt.s32.totalorder %s196_s27, %s192_s1 }
  0x2d   :  { %v62_v3 = vmul.f32 %v61_v2, %v58_v0  ;;  %v64_v4 = vstv %s139_s7  ;;  %s269_s16 = sld [smem:[#allocation8 + $0x1]] }
  0x2e   :  { %v65_v5 = vmul.f32 %v64_v4, %v59_v1  ;;  %s144_s17 = sld [smem:[#allocation3 + $0x4]]  ;;  %v68_v6 = vstv %s67_s8  ;;  %p199_p4 = por %p198_p3, %p197_p2 }
  0x2f   :  { %s145_s18 = sld [smem:[#allocation3 + $0x5]]  ;;  %v72_v17 = vstv %s261_s9 }
  0x30   :  { %v66_v7 = vadd.f32 %v65_v5, %v62_v3  ;;  %v75_v8 = vstv %s140_s11  ;;  %s146_s19 = sld [smem:[#allocation6 + $0x2]]  ;;  %p200_p5 = pnand %p199_p4, %p193_p1 }
  0x31   :  { %v76_v9 = vmul.f32 %v75_v8, %v58_v0  ;;  %v78_v10 = vstv %s141_s14  ;;  %s271_s20 = sld [smem:[#allocation8 + $0x2]] }
  0x32   :  { %v69_v11 = vadd.f32 %v68_v6, %v66_v7  ;;  %v79_v12 = vmul.f32 %v78_v10, %v59_v1  ;;  %s148_s0 = sld [smem:[#allocation3 + $0x6]]  ;;  %v82_v13 = vstv %s142_s15 }
  0x33   :  { %s149_s21 = sld [smem:[#allocation3 + $0x7]]  ;;  %v86_v22 = vstv %s269_s16 }
  0x34   :  { %v70_v14 = vmax.f32 %v69_v11, 0.0  ;;  %v80_v15 = vadd.f32 %v79_v12, %v76_v9  ;;  %v90_v16 = vstv %s144_s17  ;;  %s150_s22 = sld [smem:[#allocation6 + $0x3]] }
  0x35   :  { %v91_v18 = vmul.f32 %v90_v16, %v58_v0  ;;  %v93_v19 = vstv %s145_s18  ;;  %s151_s23 = sld [smem:[#allocation8 + $0x3]] }
  0x36   :  { %v83_v20 = vadd.f32 %v82_v13, %v80_v15  ;;  %v94_v21 = vmul.f32 %v93_v19, %v59_v1  ;;  %v97_v23 = vstv %s146_s19  ;;  %v73_v24 = vmul.f32 %v72_v17, %v70_v14 }
  0x37   :  { %v101_v33 = vstv %s271_s20 }
  0x38   :  { %v84_v25 = vmax.f32 %v83_v20, 0.0  ;;  %v95_v26 = vadd.f32 %v94_v21, %v91_v18  ;;  %v105_v27 = vstv %s148_s0 }
  0x39   :  { %v106_v28 = vmul.f32 %v105_v27, %v58_v0  ;;  %v108_v29 = vstv %s149_s21 }
  0x3a   :  { %v87_v30 = vmul.f32 %v86_v22, %v84_v25  ;;  %v98_v31 = vadd.f32 %v97_v23, %v95_v26  ;;  %v109_v32 = vmul.f32 %v108_v29, %v59_v1  ;;  %v112_v34 = vstv %s150_s22 }
  0x3b   :  { %v116_v40 = vstv %s151_s23 }
  0x3c   :  { %v88_v35 = vadd.f32 %v87_v30, %v73_v24  ;;  %v99_v36 = vmax.f32 %v98_v31, 0.0  ;;  %v110_v37 = vadd.f32 %v109_v32, %v106_v28 }
  0x3e   :  { %v102_v38 = vmul.f32 %v101_v33, %v99_v36  ;;  %v113_v39 = vadd.f32 %v112_v34, %v110_v37 }
  0x40   :  { %v103_v41 = vadd.f32 %v102_v38, %v88_v35  ;;  %v114_v42 = vmax.f32 %v113_v39, 0.0 }
  0x42   :  { %v117_v43 = vmul.f32 %v116_v40, %v114_v42 }
  0x44   :  { %v118_v45 = vadd.f32 %v117_v43, %v103_v41 }
  0x46   :  { %v121_v46 = vadd.f32 %v120_v44, %v118_v45 }
  0x48   :  { %122 = vst [vmem:[#allocation9] sm:$0x1] %v121_v46 }
  0x49   :  { %203 = shalt.err (!%p200_p5)
}
  0x4a   :  { %132 = dma.vmem_to_hbm [thread:$0]  %s130_s2, 16, %s287_s5, [#allocation4]  }
  0x4b   :  { %216 = dma.done.wait [#allocation4], 16  }
  0x4c   :  { %217 = vsyncadd [#allocation4], 4294967280 }
  0x4d   :  { %136 = vsyncpa [#allocation4], 1 }
  0x4e   :  { %137 = vsyncpa [#allocation5], 1 }
  0x4f   :  { %138 = vsyncpa [#allocation7], 1 }

</bundles_post_ra>
